<compile_context>
chip_gen: v5e
topology: v5e:2x2
jax: 0.10.0
libtpu: 0.0.40
codegen_flags: <defaults>
</compile_context>

<pallas_src>
import functools

import jax
import jax.numpy as jnp
from jax import lax
from jax.experimental import pallas as pl
from jax.experimental.pallas import tpu as pltpu


def _round_up(x, m):
    return ((x + m - 1) // m) * m


def _default_vmem_limit_bytes():
    """Generation-aware scoped-VMEM request (~3/4 of physical, capped)."""
    try:
        cap = int(pltpu.get_tpu_info().vmem_capacity_bytes)
    except Exception:
        cap = 64 * 1024 * 1024           # conservative (v7x-sized) fallback
    return int(min(cap * 3 // 4, 100 * 1024 * 1024))


_VMEM_LIMIT_BYTES = _default_vmem_limit_bytes()


def _make_conv2d_block_kernel(shifts, tile):
    """Fused kernel for a fixed (static) tap-shift table and lane tile."""

    def kernel(w1_ref, t1_ref, w2_ref, t2_ref, xc_ref, xh_ref, o_ref):
        # w1_ref: (Cout, 9*Cin)  3x3 taps stacked along K, BN1 scale folded in
        # t1_ref: (Cout, 1)      folded conv1-bias + BN1 shift (f32)
        # w2_ref: (Cout, Cout)   1x1 conv weight, BN2 scale folded in
        # t2_ref: (Cout, 1)      folded conv2-bias + BN2 shift (f32)
        # xc_ref: (1, Cin, T)    current flat-pixel tile
        # xh_ref: (1, Cin, halo) small right halo (lanes just after the tile)
        # o_ref : (1, Cout, T)   output tile, T % 128 == 0 (unmasked stores)

        # Current tile + small halo -> (Cin, T + halo); every 3x3 tap is a
        # static lane shift of this slab.
        xx = jnp.concatenate([xc_ref[0], xh_ref[0]], axis=-1)

        # Shifted-activation stack (9*Cin, T): one MXU matmul with K = 9*Cin
        # instead of nine tiny-K matmuls plus eight VALU (Cout, T) adds.
        stack = jnp.concatenate([xx[:, s:s + tile] for s in shifts], axis=0)

        acc = jnp.dot(w1_ref[...], stack, preferred_element_type=jnp.float32)
        h1 = jnp.maximum(acc + t1_ref[...], 0.0)       # folded bias+BN, ReLU

        acc2 = jnp.dot(w2_ref[...], h1.astype(w2_ref.dtype),
                       preferred_element_type=jnp.float32)
        h2 = jnp.maximum(acc2 + t2_ref[...], 0.0)

        o_ref[0] = h2.astype(o_ref.dtype)

    return kernel


@functools.partial(jax.jit, static_argnames=("eps", "compute_dtype"))
def conv2d_block_forward(x, params, *, eps=1e-5, compute_dtype=jnp.bfloat16):
    """Fused Conv2dBlock forward.

    x: (B, Cin, H, W) NCHW float32.
    params: conv1_w (Cout,Cin,3,3), conv1_b, bn1_{gamma,beta,mean,var},
            conv2_w (Cout,Cout,1,1), conv2_b, bn2_{gamma,beta,mean,var}.
    Returns (B, Cout, H, W).
    """
    B, Cin, H, W = x.shape
    w1 = params["conv1_w"]
    Cout = w1.shape[0]

    # ---- Fold conv bias + eval-mode BN: scales go into the weights, only the
    # additive shifts stay in-kernel. ----
    s1 = params["bn1_gamma"] / jnp.sqrt(params["bn1_var"] + eps)
    t1 = params["bn1_beta"] + (params["conv1_b"] - params["bn1_mean"]) * s1
    s2 = params["bn2_gamma"] / jnp.sqrt(params["bn2_var"] + eps)
    t2 = params["bn2_beta"] + (params["conv2_b"] - params["bn2_mean"]) * s2

    # (Cout, 9*Cin): tap-major / channel-minor, matching the in-kernel stack.
    w1s = jnp.transpose(w1, (0, 2, 3, 1)).reshape(Cout, 9 * Cin)
    w1s = (s1[:, None] * w1s).astype(compute_dtype)
    w2s = (s2[:, None] * params["conv2_w"].reshape(Cout, Cout)).astype(compute_dtype)
    t1c = t1.reshape(Cout, 1).astype(jnp.float32)
    t2c = t2.reshape(Cout, 1).astype(jnp.float32)

    # ---- Flattened, lane-dense, zero-padded layout. ----
    Wp = W + 2                        # padded row width (1 col left/right)
    S = 2 * Wp + 2                    # largest tap shift (dh=2, dw=2)
    halo = _round_up(max(S, 128), 128)
    L_valid = H * Wp                  # flat range containing every valid output

    # Lane tile: multiple of `halo` (so the halo block index is exact), sized
    # from the per-generation VMEM budget; whole image in one tile if it fits.
    bpx = jnp.dtype(compute_dtype).itemsize
    per_lane = (2 * bpx * Cin         # x tile, double-buffered
                + 2 * 4 * Cout        # output tile (f32), double-buffered
                + bpx * Cin           # xx slab
                + 9 * bpx * Cin       # shifted-activation stack
                + 3 * 4 * Cout)       # f32 acc/h1/acc2 temporaries
    budget = int(_VMEM_LIMIT_BYTES * 0.7)
    tile = max(halo, (budget // per_lane) // halo * halo)
    tile = min(tile, _round_up(L_valid, halo))
    nt = -(-L_valid // tile)          # ceil-div
    L_out = nt * tile
    Lin = L_out + halo                # last tile's halo block stays in-bounds

    # Padded flat input (B, Cin, Lin): 1 zero row on top, zero rows at the
    # bottom (bottom boundary + last-tile halo), 1 zero column left/right.
    rows = -(-Lin // Wp)
    xp = jnp.pad(x.astype(compute_dtype),
                 ((0, 0), (0, 0), (1, rows - H - 1), (1, 1)))
    x_flat = xp.reshape(B, Cin, rows * Wp)[:, :, :Lin]

    shifts = tuple(dh * Wp + dw for dh in range(3) for dw in range(3))
    kernel = _make_conv2d_block_kernel(shifts, tile)

    hb = tile // halo                 # halo blocks per tile
    if nt >= B:                       # larger extent leads (balanced v7x megacore)
        grid = (nt, B)
        xmap = lambda t, b: (b, 0, t)
        hmap = lambda t, b: (b, 0, (t + 1) * hb)
        omap = lambda t, b: (b, 0, t)
    else:
        grid = (B, nt)
        xmap = lambda b, t: (b, 0, t)
        hmap = lambda b, t: (b, 0, (t + 1) * hb)
        omap = lambda b, t: (b, 0, t)
    wmap = lambda *_: (0, 0)

    out_flat = pl.pallas_call(
        kernel,
        out_shape=jax.ShapeDtypeStruct((B, Cout, L_out), x.dtype),
        grid_spec=pltpu.PrefetchScalarGridSpec(
            num_scalar_prefetch=0,
            grid=grid,
            in_specs=[
                pl.BlockSpec((Cout, 9 * Cin), wmap),   # stacked conv1 taps (resident)
                pl.BlockSpec((Cout, 1), wmap),         # shift1
                pl.BlockSpec((Cout, Cout), wmap),      # conv2 weight
                pl.BlockSpec((Cout, 1), wmap),         # shift2
                pl.BlockSpec((1, Cin, tile), xmap),    # x: current tile
                pl.BlockSpec((1, Cin, halo), hmap),    # x: small right halo
            ],
            out_specs=pl.BlockSpec((1, Cout, tile), omap),
        ),
        compiler_params=pltpu.CompilerParams(
            dimension_semantics=("parallel", "parallel"),
            vmem_limit_bytes=_VMEM_LIMIT_BYTES,
        ),
    )(w1s, t1c, w2s, t2c, x_flat, x_flat)

    # Valid outputs live at flat index h*Wp + w (w < W); padded columns / tail
    # rows hold wasted-but-discarded values -- do NOT remove this slice.
    out = out_flat[:, :, :L_valid].reshape(B, Cout, H, Wp)[:, :, :, :W]
    return out


def init_conv2d_block_params(key, left, right, dtype=jnp.float32):
    """Match weight_init: kaiming_normal_(fan_in, relu) conv weights, zero
    biases, BN gamma=1 / beta=0 and fresh running stats (mean=0, var=1)."""
    k1, k2 = jax.random.split(key)
    std1 = (2.0 / (left * 3 * 3)) ** 0.5
    std2 = (2.0 / (right * 1 * 1)) ** 0.5
    return {
        "conv1_w": std1 * jax.random.normal(k1, (right, left, 3, 3), dtype=dtype),
        "conv1_b": jnp.zeros((right,), dtype),
        "bn1_gamma": jnp.ones((right,), dtype),
        "bn1_beta": jnp.zeros((right,), dtype),
        "bn1_mean": jnp.zeros((right,), dtype),
        "bn1_var": jnp.ones((right,), dtype),
        "conv2_w": std2 * jax.random.normal(k2, (right, right, 1, 1), dtype=dtype),
        "conv2_b": jnp.zeros((right,), dtype),
        "bn2_gamma": jnp.ones((right,), dtype),
        "bn2_beta": jnp.zeros((right,), dtype),
        "bn2_mean": jnp.zeros((right,), dtype),
        "bn2_var": jnp.ones((right,), dtype),
    }


def _reference_forward(x, params, eps=1e-5):
    """Plain-JAX reference (eval-mode BN), unfused."""
    def bn(y, g, be, m, v):
        return ((y - m[None, :, None, None])
                / jnp.sqrt(v[None, :, None, None] + eps)
                * g[None, :, None, None] + be[None, :, None, None])

    y = lax.conv_general_dilated(x, params["conv1_w"], (1, 1), ((1, 1), (1, 1)),
                                 dimension_numbers=("NCHW", "OIHW", "NCHW"))
    y = y + params["conv1_b"][None, :, None, None]
    y = jnp.maximum(bn(y, params["bn1_gamma"], params["bn1_beta"],
                       params["bn1_mean"], params["bn1_var"]), 0.0)
    w2 = params["conv2_w"][:, :, 0, 0]
    y = jnp.einsum("oc,bchw->bohw", w2, y) + params["conv2_b"][None, :, None, None]
    y = jnp.maximum(bn(y, params["bn2_gamma"], params["bn2_beta"],
                       params["bn2_mean"], params["bn2_var"]), 0.0)
    return y


if __name__ == "__main__":
    key = jax.random.PRNGKey(0)
    k_x, k_p = jax.random.split(key)

    B, left, right, H, W = 2, 4, 8, 16, 16
    x = jax.random.normal(k_x, (B, left, H, W), dtype=jnp.float32)
    params = init_conv2d_block_params(k_p, left, right)

    # Default fast path: bf16 matmul inputs, f32 accumulation.
    out = jax.block_until_ready(conv2d_block_forward(x, params))
    assert out.shape == (B, right, H, W)

    ref = _reference_forward(x, params)

    # Tight correctness gate with an f32-compute run of the same kernel.
    out_f32 = jax.block_until_ready(
        conv2d_block_forward(x, params, compute_dtype=jnp.float32))
    assert jnp.allclose(out_f32, ref, atol=1e-4, rtol=1e-4), \
        float(jnp.max(jnp.abs(out_f32 - ref)))

    # Looser sanity check for the bf16 path.
    assert jnp.allclose(out, ref, atol=1e-1, rtol=1e-1), \
        float(jnp.max(jnp.abs(out - ref)))

    print("KERNEL_OK")
</pallas_src>

<mosaic_0001>
module attributes {stable_mosaic.version = 11 : i64} {
  func.func @kernel(%arg0: i32, %arg1: i32, %arg2: memref<8x36xbf16, #tpu.memory_space<vmem>>, %arg3: memref<8x1xf32, #tpu.memory_space<vmem>>, %arg4: memref<8x8xbf16, #tpu.memory_space<vmem>>, %arg5: memref<8x1xf32, #tpu.memory_space<vmem>>, %arg6: memref<1x4x384xbf16, #tpu.memory_space<vmem>>, %arg7: memref<1x4x128xbf16, #tpu.memory_space<vmem>>, %arg8: memref<1x8x384xf32, #tpu.memory_space<vmem>>) attributes {dimension_semantics = [#tpu.dimension_semantics<parallel>, #tpu.dimension_semantics<parallel>], iteration_bounds = array<i64: 2, 1>, scalar_prefetch = 0 : i64, scratch_operands = 0 : i64, tpu.core_type = #tpu.core_type<tc>, window_params = [{pipeline_mode = #tpu.pipeline_mode<synchronous>, transform_indices = @transform_0, window_bounds = array<i64: 8, 36>}, {pipeline_mode = #tpu.pipeline_mode<synchronous>, transform_indices = @transform_1, window_bounds = array<i64: 8, 1>}, {pipeline_mode = #tpu.pipeline_mode<synchronous>, transform_indices = @transform_2, window_bounds = array<i64: 8, 8>}, {pipeline_mode = #tpu.pipeline_mode<synchronous>, transform_indices = @transform_3, window_bounds = array<i64: 8, 1>}, {transform_indices = @transform_4, window_bounds = array<i64: 1, 4, 384>}, {transform_indices = @transform_5, window_bounds = array<i64: 1, 4, 128>}, {transform_indices = @transform_6, window_bounds = array<i64: 1, 8, 384>}]} {
    %c0 = arith.constant 0 : index
    %c0_0 = arith.constant 0 : index
    %c0_1 = arith.constant 0 : index
    %0 = vector.load %arg6[%c0, %c0_0, %c0_1] : memref<1x4x384xbf16, #tpu.memory_space<vmem>>, vector<1x4x384xbf16>
    %1 = vector.shape_cast %0 : vector<1x4x384xbf16> to vector<4x384xbf16>
    %c0_2 = arith.constant 0 : index
    %c0_3 = arith.constant 0 : index
    %c0_4 = arith.constant 0 : index
    %2 = vector.load %arg7[%c0_2, %c0_3, %c0_4] : memref<1x4x128xbf16, #tpu.memory_space<vmem>>, vector<1x4x128xbf16>
    %3 = vector.shape_cast %2 : vector<1x4x128xbf16> to vector<4x128xbf16>
    %4 = tpu.concatenate %1, %3 in 1 : vector<4x384xbf16>, vector<4x128xbf16> -> vector<4x512xbf16>
    %5 = vector.extract_strided_slice %4 {offsets = [0, 0], sizes = [4, 384], strides = [1, 1]} : vector<4x512xbf16> to vector<4x384xbf16>
    %6 = vector.extract_strided_slice %4 {offsets = [0, 1], sizes = [4, 384], strides = [1, 1]} : vector<4x512xbf16> to vector<4x384xbf16>
    %7 = vector.extract_strided_slice %4 {offsets = [0, 2], sizes = [4, 384], strides = [1, 1]} : vector<4x512xbf16> to vector<4x384xbf16>
    %8 = vector.extract_strided_slice %4 {offsets = [0, 18], sizes = [4, 384], strides = [1, 1]} : vector<4x512xbf16> to vector<4x384xbf16>
    %9 = vector.extract_strided_slice %4 {offsets = [0, 19], sizes = [4, 384], strides = [1, 1]} : vector<4x512xbf16> to vector<4x384xbf16>
    %10 = vector.extract_strided_slice %4 {offsets = [0, 20], sizes = [4, 384], strides = [1, 1]} : vector<4x512xbf16> to vector<4x384xbf16>
    %11 = vector.extract_strided_slice %4 {offsets = [0, 36], sizes = [4, 384], strides = [1, 1]} : vector<4x512xbf16> to vector<4x384xbf16>
    %12 = vector.extract_strided_slice %4 {offsets = [0, 37], sizes = [4, 384], strides = [1, 1]} : vector<4x512xbf16> to vector<4x384xbf16>
    %13 = vector.extract_strided_slice %4 {offsets = [0, 38], sizes = [4, 384], strides = [1, 1]} : vector<4x512xbf16> to vector<4x384xbf16>
    %14 = tpu.concatenate %5, %6, %7, %8, %9, %10, %11, %12, %13 in 0 : vector<4x384xbf16>, vector<4x384xbf16>, vector<4x384xbf16>, vector<4x384xbf16>, vector<4x384xbf16>, vector<4x384xbf16>, vector<4x384xbf16>, vector<4x384xbf16>, vector<4x384xbf16> -> vector<36x384xbf16>
    %c0_5 = arith.constant 0 : index
    %c0_6 = arith.constant 0 : index
    %15 = vector.load %arg2[%c0_5, %c0_6] : memref<8x36xbf16, #tpu.memory_space<vmem>>, vector<8x36xbf16>
    %cst = arith.constant dense<0.000000e+00> : vector<8x384xf32>
    %16 = tpu.matmul %15, %14, %cst {dimension_numbers = #tpu.dot_dimension_numbers<[1], [0], [0], [1], [0, 0, 1, 1], [], []>} : vector<8x36xbf16>, vector<36x384xbf16>, vector<8x384xf32> -> vector<8x384xf32>
    %c0_7 = arith.constant 0 : index
    %c0_8 = arith.constant 0 : index
    %17 = vector.load %arg3[%c0_7, %c0_8] : memref<8x1xf32, #tpu.memory_space<vmem>>, vector<8x1xf32>
    %18 = vector.broadcast %17 : vector<8x1xf32> to vector<8x384xf32>
    %19 = arith.addf %16, %18 : vector<8x384xf32>
    %cst_9 = arith.constant 0.000000e+00 : f32
    %20 = vector.broadcast %cst_9 : f32 to vector<8x384xf32>
    %21 = arith.maximumf %19, %20 : vector<8x384xf32>
    %c0_10 = arith.constant 0 : index
    %c0_11 = arith.constant 0 : index
    %22 = vector.load %arg4[%c0_10, %c0_11] : memref<8x8xbf16, #tpu.memory_space<vmem>>, vector<8x8xbf16>
    %23 = arith.truncf %21 : vector<8x384xf32> to vector<8x384xbf16>
    %cst_12 = arith.constant dense<0.000000e+00> : vector<8x384xf32>
    %24 = tpu.matmul %22, %23, %cst_12 {dimension_numbers = #tpu.dot_dimension_numbers<[1], [0], [0], [1], [0, 0, 1, 1], [], []>} : vector<8x8xbf16>, vector<8x384xbf16>, vector<8x384xf32> -> vector<8x384xf32>
    %c0_13 = arith.constant 0 : index
    %c0_14 = arith.constant 0 : index
    %25 = vector.load %arg5[%c0_13, %c0_14] : memref<8x1xf32, #tpu.memory_space<vmem>>, vector<8x1xf32>
    %26 = vector.broadcast %25 : vector<8x1xf32> to vector<8x384xf32>
    %27 = arith.addf %24, %26 : vector<8x384xf32>
    %cst_15 = arith.constant 0.000000e+00 : f32
    %28 = vector.broadcast %cst_15 : f32 to vector<8x384xf32>
    %29 = arith.maximumf %27, %28 : vector<8x384xf32>
    %c0_16 = arith.constant 0 : index
    %c0_17 = arith.constant 0 : index
    %c0_18 = arith.constant 0 : index
    %30 = vector.load %arg8[%c0_16, %c0_17, %c0_18] : memref<1x8x384xf32, #tpu.memory_space<vmem>>, vector<1x8x384xf32>
    %31 = vector.shape_cast %30 : vector<1x8x384xf32> to vector<8x384xf32>
    %32 = vector.shape_cast %29 : vector<8x384xf32> to vector<1x8x384xf32>
    tpu.vector_store %arg8[%c0_16, %c0_17, %c0_18], %32 {strides = array<i32>} : memref<1x8x384xf32, #tpu.memory_space<vmem>>, vector<1x8x384xf32>,
    return
  }
  func.func @transform_0(%arg0: i32, %arg1: i32) -> (i32, i32) {
    %c0_i32 = arith.constant 0 : i32
    %c0_i32_0 = arith.constant 0 : i32
    %c0_i32_1 = arith.constant 0 : i32
    return %c0_i32, %c0_i32_0 : i32, i32
  }
  func.func @transform_1(%arg0: i32, %arg1: i32) -> (i32, i32) {
    %c0_i32 = arith.constant 0 : i32
    %c0_i32_0 = arith.constant 0 : i32
    %c0_i32_1 = arith.constant 0 : i32
    return %c0_i32, %c0_i32_0 : i32, i32
  }
  func.func @transform_2(%arg0: i32, %arg1: i32) -> (i32, i32) {
    %c0_i32 = arith.constant 0 : i32
    %c0_i32_0 = arith.constant 0 : i32
    %c0_i32_1 = arith.constant 0 : i32
    return %c0_i32, %c0_i32_0 : i32, i32
  }
  func.func @transform_3(%arg0: i32, %arg1: i32) -> (i32, i32) {
    %c0_i32 = arith.constant 0 : i32
    %c0_i32_0 = arith.constant 0 : i32
    %c0_i32_1 = arith.constant 0 : i32
    return %c0_i32, %c0_i32_0 : i32, i32
  }
  func.func @transform_4(%arg0: i32, %arg1: i32) -> (i32, i32, i32) {
    %c0_i32 = arith.constant 0 : i32
    %c0_i32_0 = arith.constant 0 : i32
    return %arg0, %c0_i32, %arg1 : i32, i32, i32
  }
  func.func @transform_5(%arg0: i32, %arg1: i32) -> (i32, i32, i32) {
    %c1_i32 = arith.constant 1 : i32
    %0 = arith.addi %arg1, %c1_i32 : i32
    %c3_i32 = arith.constant 3 : i32
    %1 = arith.muli %0, %c3_i32 : i32
    %c0_i32 = arith.constant 0 : i32
    %c0_i32_0 = arith.constant 0 : i32
    return %arg0, %c0_i32, %1 : i32, i32, i32
  }
  func.func @transform_6(%arg0: i32, %arg1: i32) -> (i32, i32, i32) {
    %c0_i32 = arith.constant 0 : i32
    %c0_i32_0 = arith.constant 0 : i32
    return %arg0, %c0_i32, %arg1 : i32, i32, i32
  }
}

</mosaic_0001>

<bundles_post_ra>
// kernel: conv2d_block_forward.1
= control target key start
LH: loop header
LB: loop body
LE: loop exit
PB: predicated region body
PF: predicated region fallthrough
CT: control target
= control target key end

     0   :  { %s885_s21 = smov 0   ;;  %s887_s22 = smov 0   ;;  %s1047_s0 = inlined_call_operand.vmem [shape: bf16[8,36], index: 0, kind: input, shape index: {}]   ;;  %s1048_s1 = inlined_call_operand.vmem [shape: f32[8,1], index: 1, kind: input, shape index: {}]   ;;  %s1049_s2 = inlined_call_operand.vmem [shape: bf16[8,8], index: 2, kind: input, shape index: {}]   ;;  %s1050_s3 = inlined_call_operand.vmem [shape: f32[8,1], index: 3, kind: input, shape index: {}]   ;;  %s1051_s4 = inlined_call_operand.vmem [shape: bf16[2,4,512], index: 4, kind: input, shape index: {}, may-alias: {4,5}]   ;;  %s1052_s5 = inlined_call_operand.vmem [shape: bf16[2,4,512], index: 5, kind: input, shape index: {}, may-alias: {4,5}]   ;;  %s1053_s6 = inlined_call_operand.vmem [shape: f32[2,8,384], index: 6, kind: output, shape index: {}]  }
   0x1   :  { %s889_s23 = smov 0  }
   0x2 LB: > { %s28_s24 = sadd.s32 1, %s835_s22  ;;  %p763_p0 = scmp.ge.s32.totalorder %s839_s23, 1  ;;  %s839_s23 = sphi %s889_s23, %s16_s23   ;;  %s835_s22 = sphi %s887_s22, %s1055_s22   ;;  %s831_s21 = sphi %s885_s21, %s1054_s21  }
   0x3   : > { %p30_p1 = scmp.ge.s32.totalorder %s28_s24, 2  ;;  %p264_p2 = scmp.lt.s32.totalorder %s839_s23, 3 }
   0x5   : > { %s1057_s24 = smov (%p30_p1, %s28_s24), 0  ;;  %p265_p3 = pnand %p763_p0, %p264_p2 }
   0x6   : > { %p321_p4 = scmp.lt.s32.totalorder (!%p265_p3), %s831_s21, 1  ;;  %s841_s29 = smov (!%p265_p3), 109  }
   0x7   : > { %268 = sbr.rel (%p265_p3) target bundleno = 500 (0x1f4), region = 44  ;;  %s842_s30 = smov (!%p265_p3), 90  }
   0x8   : > { %s843_s7 = smov (!%p265_p3), 108   ;;  %s844_s8 = smov (!%p265_p3), 92  }
   0x9   : > { %s845_s9 = smov (!%p265_p3), 91   ;;  %s846_s10 = smov (!%p265_p3), 127  }
   0xa   : > { %s847_s11 = smov (!%p265_p3), 126   ;;  %s848_s13 = smov (!%p265_p3), 110  }
   0xc   : > { %s1059_s21 = smov (!%p321_p4, %s831_s21), 1  ;;  %vm472_vm0 = vcmask 736256   ;;  %vm476_vm1 = vcmask 1041408   ;;  %vm436_vm2 = vcmask 883712   ;;  %vm424_vm3 = vcmask 891904   ;;  %v525_v58 = vld [vmem:[%s1048_s1] sm:$0xff] }
   0xd   : > { %s777_s25 = sshll.u32 %s1059_s21, 3  ;;  %vm448_vm4 = vcmask 752640   ;;  %vm460_vm5 = vcmask 744448   ;;  %vm483_vm6 = vcmask 1043456   ;;  %vm490_vm7 = vcmask 1045504  }
   0xe   : > { %s328_s28 = scalar_lea.vmem %s1051_s4, %s777_s25  ;;  %s779_s12 = sadd.s32 6, %s777_s25  ;;  %vm380_vm8 = vcmask 1039360   ;;  %vm396_vm9 = vcmask 1031168   ;;  %vm412_vm10 = vcmask 900096   ;;  %v524_v54 = vld [vmem:[%s1047_s0] sm:$0xf] }
   0xf   : > { %v357_v0 = vld [vmem:[%s328_s28] sm:$0x3f]  ;;  %s343_s16 = scalar_lea.vmem %s1052_s5, %s779_s12  ;;  %vm531_vm11 = vcmask 293888   ;;  %v849_v59 = vmov 0   ;;  %vm596_vm12 = vcmask 64512  }
  0x10   : > { %360 = vst [vmem:[#allocation1] ss:$4 sm:$0xff] %v357_v0  ;;  %v358_v10 = vld [vmem:[%s343_s16] sm:$0x3]  ;;  %815 = vset.pattern.permute.xlu2 %v849_v59  ;;  %816 = vset.pattern.permute.xlu0 %v849_v59 }
  0x11   : > { %v371_v12 = vrot.slane %v358_v10, 6  ;;  %v387_v14 = vrot.slane %v358_v10, 4  ;;  %v403_v16 = vrot.slane %v358_v10, 2 }
  0x17   : > { %v911_v1 = vld.sshfl [vmem:[#allocation1] sm:$0xff pattern:$0x73625140]  ;;  %v919_v3 = vld.sshfl [vmem:[#allocation1 + $0x8] sm:$0xff pattern:$0x73625140] }
  0x18   : > { %416 = vrot.lane.b32.xlu1 %v911_v1, %s841_s29  ;;  %464 = vrot.lane.b32.xlu0 %v911_v1, %s842_s30  ;;  %v368_v2 = vrot.slane %v911_v1, 6  ;;  %v369_v4 = vrot.slane %v919_v3, 6  ;;  %v385_v5 = vrot.slane %v919_v3, 4  ;;  %v384_v6 = vrot.slane %v911_v1, 4 }
  0x19   : > { %v400_v7 = vrot.slane %v911_v1, 2  ;;  %v401_v8 = vrot.slane %v919_v3, 2  ;;  %v940_v9 = vld.sshfl [vmem:[#allocation1 + $0x10] sm:$0xff pattern:$0x73625140] }
  0x1a   : > { %428 = vrot.lane.b32.xlu2 %v368_v2, %s843_s7  ;;  %v370_v11 = vrot.slane %v940_v9, 6  ;;  %v386_v13 = vrot.slane %v940_v9, 4  ;;  %v402_v15 = vrot.slane %v940_v9, 2 }
  0x20   : > { %418 = vrot.lane.b32.xlu1 %v919_v3, %s841_s29  ;;  %466 = vrot.lane.b32.xlu0 %v919_v3, %s842_s30 }
  0x22   : > { %430 = vrot.lane.b32.xlu2 %v369_v4, %s843_s7 }
  0x28   : > { %442 = vrot.lane.b32.xlu1 %v385_v5, %s844_s8  ;;  %440 = vrot.lane.b32.xlu0 %v384_v6, %s844_s8 }
  0x2a   : > { %452 = vrot.lane.b32.xlu2 %v400_v7, %s845_s9 }
  0x30   : > { %454 = vrot.lane.b32.xlu0 %v401_v8, %s845_s9  ;;  %372 = vrot.lane.b32.xlu1 %v368_v2, %s846_s10 }
  0x32   : > { %374 = vrot.lane.b32.xlu2 %v369_v4, %s846_s10 }
  0x38   : > { %388 = vrot.lane.b32.xlu0 %v384_v6, %s847_s11  ;;  %390 = vrot.lane.b32.xlu1 %v385_v5, %s847_s11 }
  0x3a   : > { %404 = vrot.lane.b32.xlu2 %v400_v7, %s848_s13 }
  0x40   : > { %406 = vrot.lane.b32.xlu0 %v401_v8, %s848_s13  ;;  %468 = vrot.lane.b32.xlu1 %v940_v9, %s842_s30 }
  0x42   : > { %470 = vrot.lane.b32.xlu2 %v358_v10, %s842_s30 }
  0x48   : > { %420 = vrot.lane.b32.xlu0 %v940_v9, %s841_s29  ;;  %422 = vrot.lane.b32.xlu1 %v358_v10, %s841_s29  ;;  %s781_s29 = smul.u32 24, %s1059_s21 }
  0x4a   : > { %432 = vrot.lane.b32.xlu2 %v370_v11, %s843_s7 }
  0x50   : > { %434 = vrot.lane.b32.xlu0 %v371_v12, %s843_s7  ;;  %444 = vrot.lane.b32.xlu1 %v386_v13, %s844_s8 }
  0x52   : > { %446 = vrot.lane.b32.xlu2 %v387_v14, %s844_s8  ;;  %s354_s8 = scalar_lea.vmem %s1053_s6, %s781_s29 }
  0x58   : > { %456 = vrot.lane.b32.xlu0 %v402_v15, %s845_s9  ;;  %458 = vrot.lane.b32.xlu1 %v403_v16, %s845_s9 }
  0x5a   : > { %376 = vrot.lane.b32.xlu2 %v370_v11, %s846_s10 }
  0x60   : > { %378 = vrot.lane.b32.xlu0 %v371_v12, %s846_s10  ;;  %392 = vrot.lane.b32.xlu1 %v386_v13, %s847_s11 }
  0x62   : > { %394 = vrot.lane.b32.xlu2 %v387_v14, %s847_s11 }
  0x68   : > { %408 = vrot.lane.b32.xlu0 %v402_v15, %s848_s13  ;;  %410 = vrot.lane.b32.xlu1 %v403_v16, %s848_s13 }
  0x6a   : > { %528 = vperm.xlu2 %815, %v525_v58  }
  0x74   : > { %v429_v17 = vpop.permute.xlu2 %428 }
  0x7c   : > { %v957_v18 = vpop.permute.xlu2 %430 }
  0x7d   : > { %v437_v29 = vsel %vm436_vm2, %v429_v17, %v957_v18 }
  0x84   : > { %v453_v21 = vpop.permute.xlu2 %452 }
  0x8a   : > { %v417_v19 = vpop.permute.xlu1 %416  ;;  %v465_v20 = vpop.permute.xlu0 %464 }
  0x8c   : > { %v961_v28 = vpop.permute.xlu2 %374 }
  0x92   : > { %v419_v22 = vpop.permute.xlu1 %418  ;;  %v467_v23 = vpop.permute.xlu0 %466 }
  0x93   : > { %v473_v24 = vsel %vm472_vm0, %v465_v20, %v467_v23  ;;  %v425_v30 = vsel %vm424_vm3, %v417_v19, %v419_v22 }
  0x94   : > { %v536_v25 = vsel %vm476_vm1, %v473_v24, 0  ;;  %v502_v32 = vsel %vm476_vm1, %v425_v30, %v437_v29  ;;  %v405_v38 = vpop.permute.xlu2 %404 }
  0x95   : > { %549 = vmatpush.bf16.msra.mxu0 %v536_v25 }
  0x9a   : > { %v443_v26 = vpop.permute.xlu1 %442  ;;  %v441_v27 = vpop.permute.xlu0 %440 }
  0x9b   : > { %v449_v31 = vsel %vm448_vm4, %v441_v27, %v443_v26 }
  0x9c   : > { %v510_v36 = vsel %vm483_vm6, %v502_v32, %v449_v31  ;;  %v471_v41 = vpop.permute.xlu2 %470 }
  0xa2   : > { %v455_v33 = vpop.permute.xlu0 %454  ;;  %v373_v34 = vpop.permute.xlu1 %372 }
  0xa3   : > { %v461_v35 = vsel %vm460_vm5, %v453_v21, %v455_v33  ;;  %v381_v42 = vsel %vm380_vm8, %v373_v34, %v961_v28 }
  0xa4   : > { %v516_v37 = vsel %vm490_vm7, %v510_v36, %v461_v35  ;;  %v478_v44 = vsel %vm476_vm1, %v911_v1, %v381_v42  ;;  %v433_v55 = vpop.permute.xlu2 %432 }
  0xa5   : > { %550 = vmatpush.bf16.msra.mxu0 %v516_v37  ;;  %v438_v6 = vsel %vm436_vm2, %v957_v18, %v433_v55 }
  0xaa   : > { %v389_v39 = vpop.permute.xlu0 %388  ;;  %v391_v40 = vpop.permute.xlu1 %390 }
  0xab   : > { %v397_v43 = vsel %vm396_vm9, %v389_v39, %v391_v40 }
  0xac   : > { %v485_v48 = vsel %vm483_vm6, %v478_v44, %v397_v43  ;;  %v447_v62 = vpop.permute.xlu2 %446 }
  0xb2   : > { %v407_v45 = vpop.permute.xlu0 %406  ;;  %v469_v46 = vpop.permute.xlu1 %468 }
  0xb3   : > { %v413_v47 = vsel %vm412_vm10, %v405_v38, %v407_v45  ;;  %v474_v49 = vsel %vm472_vm0, %v467_v23, %v469_v46  ;;  %v475_v50 = vsel %vm472_vm0, %v469_v46, %v471_v41  ;;  %v590_v41 = vld [vmem:[%s1050_s3] sm:$0xff] }
  0xb4   : > { %v492_v51 = vsel %vm490_vm7, %v485_v48, %v413_v47  ;;  %v539_v52 = vsel %vm476_vm1, %v474_v49, 0  ;;  %v542_v53 = vsel %vm476_vm1, %v475_v50, 0  ;;  %v377_v17 = vpop.permute.xlu2 %376  ;;  %593 = vperm.xlu0 %816, %v590_v41  }
  0xb5   : > { %551 = vmatpush.bf16.msra.mxu0 %v492_v51  ;;  %562 = vmatpush.bf16.msra.mxu1 %v539_v52 }
  0xb6   : > { %575 = vmatpush.bf16.msra.mxu2 %v542_v53 }
  0xb8   : > { %769 = vmatmul.msk.bf16.vlgmr.msra.gmra.mxu0 %vm531_vm11, %v524_v54 }
  0xba   : > { %v421_v56 = vpop.permute.xlu0 %420  ;;  %v423_v57 = vpop.permute.xlu1 %422 }
  0xbb   : > { %v426_v0 = vsel %vm424_vm3, %v419_v22, %v421_v56  ;;  %v427_v1 = vsel %vm424_vm3, %v421_v56, %v423_v57  ;;  %v382_v22 = vsel %vm380_vm8, %v961_v28, %v377_v17 }
  0xbc   : > { %v505_v7 = vsel %vm476_vm1, %v426_v0, %v438_v6  ;;  %v395_v21 = vpop.permute.xlu2 %394 }
  0xc2   : > { %v435_v60 = vpop.permute.xlu0 %434  ;;  %v445_v61 = vpop.permute.xlu1 %444 }
  0xc3   : > { %v439_v63 = vsel %vm436_vm2, %v433_v55, %v435_v60  ;;  %v450_v4 = vsel %vm448_vm4, %v443_v26, %v445_v61  ;;  %v451_v5 = vsel %vm448_vm4, %v445_v61, %v447_v62  ;;  %v480_v26 = vsel %vm476_vm1, %v919_v3, %v382_v22 }
  0xc4   : > { %v508_v2 = vsel %vm476_vm1, %v427_v1, %v439_v63  ;;  %v512_v13 = vsel %vm483_vm6, %v505_v7, %v450_v4  ;;  %v529_v3 = vpop.permute.xlu2 %528 }
  0xc5   : > { %v514_v14 = vsel %vm483_vm6, %v508_v2, %v451_v5 }
  0xca   : > { %v457_v8 = vpop.permute.xlu0 %456  ;;  %v459_v10 = vpop.permute.xlu1 %458 }
  0xcb   : > { %v462_v11 = vsel %vm460_vm5, %v455_v33, %v457_v8  ;;  %v463_v12 = vsel %vm460_vm5, %v457_v8, %v459_v10 }
  0xcc   : > { %v519_v15 = vsel %vm490_vm7, %v512_v13, %v462_v11  ;;  %v522_v16 = vsel %vm490_vm7, %v514_v14, %v463_v12 }
  0xcd   : > { %563 = vmatpush.bf16.msra.mxu1 %v519_v15  ;;  %576 = vmatpush.bf16.msra.mxu2 %v522_v16 }
  0xd2   : > { %v379_v18 = vpop.permute.xlu0 %378  ;;  %v393_v19 = vpop.permute.xlu1 %392 }
  0xd3   : > { %v383_v20 = vsel %vm380_vm8, %v377_v17, %v379_v18  ;;  %v398_v24 = vsel %vm396_vm9, %v391_v40, %v393_v19  ;;  %v399_v25 = vsel %vm396_vm9, %v393_v19, %v395_v21  ;;  %v586_v40 = vld [vmem:[%s1049_s2] sm:$0xf] }
  0xd4   : > { %v482_v23 = vsel %vm476_vm1, %v940_v9, %v383_v20  ;;  %v487_v32 = vsel %vm483_vm6, %v480_v26, %v398_v24 }
  0xd5   : > { %v489_v28 = vsel %vm483_vm6, %v482_v23, %v399_v25 }
  0xda   : > { %v409_v27 = vpop.permute.xlu0 %408  ;;  %v411_v29 = vpop.permute.xlu1 %410 }
  0xdb   : > { %v414_v30 = vsel %vm412_vm10, %v407_v45, %v409_v27  ;;  %v415_v31 = vsel %vm412_vm10, %v409_v27, %v411_v29 }
  0xdc   : > { %v495_v33 = vsel %vm490_vm7, %v487_v32, %v414_v30  ;;  %v498_v9 = vsel %vm490_vm7, %v489_v28, %v415_v31 }
  0xdd   : > { %564 = vmatpush.bf16.msra.mxu1 %v495_v33  ;;  %577 = vmatpush.bf16.msra.mxu2 %v498_v9 }
  0xe0   : > { %770 = vmatmul.msk.bf16.vlgmr.msra.gmra.mxu1 %vm531_vm11, %v524_v54  ;;  %771 = vmatmul.msk.bf16.vlgmr.msra.gmra.mxu2 %vm531_vm11, %v524_v54 }
 0x126   : > { %v594_v54 = vpop.permute.xlu0 %593 }
 0x135   : > { %v553_v34 = vpop.f32.mrf.mxu0 }
 0x136   : > { %v554_v35 = vadd.f32 %v553_v34, %v529_v3 }
 0x138   : > { %v583_v36 = vmax.f32 %v554_v35, 0.0 }
 0x13a   : > { %v587_v37 = vpack.c.bf16 %v583_v36, %v583_v36 }
 0x13c   : > { %v601_v38 = vsel %vm483_vm6, %v587_v37, 0 }
 0x13d   : > { %v555_v39 = vpop.f32.mrf.mxu0  ;;  %616 = vmatpush.bf16.msra.mxu3 %v601_v38 }
 0x140   : > { %772 = vmatmul.msk.bf16.vlgmr.msra.gmra.mxu3 %vm596_vm12, %v586_v40 }
 0x15d   : > { %v566_v42 = vpop.f32.mrf.mxu1 }
 0x15e   : > { %v567_v43 = vadd.f32 %v566_v42, %v529_v3 }
 0x160   : > { %v584_v44 = vmax.f32 %v567_v43, 0.0 }
 0x162   : > { %v588_v45 = vpack.c.bf16 %v584_v44, %v584_v44 }
 0x163   : > { %v579_v46 = vpop.f32.mrf.mxu2 }
 0x164   : > { %v580_v47 = vadd.f32 %v579_v46, %v529_v3  ;;  %v604_v48 = vsel %vm483_vm6, %v588_v45, 0 }
 0x165   : > { %v568_v49 = vpop.f32.mrf.mxu1  ;;  %629 = vmatpush.bf16.msrb.mxu3 %v604_v48 }
 0x166   : > { %v585_v50 = vmax.f32 %v580_v47, 0.0 }
 0x168   : > { %v589_v51 = vpack.c.bf16 %v585_v50, %v585_v50  ;;  %773 = vmatmul.msk.bf16.vlgmr.msrb.gmra.mxu3 %vm596_vm12, %v586_v40 }
 0x16a   : > { %v607_v52 = vsel %vm483_vm6, %v589_v51, 0 }
 0x16b   : > { %v581_v53 = vpop.f32.mrf.mxu2  ;;  %642 = vmatpush.bf16.msrb.mxu0 %v607_v52 }
 0x16e   : > { %774 = vmatmul.msk.bf16.vlgmr.msrb.gmra.mxu0 %vm596_vm12, %v586_v40 }
 0x1c3   : > { %v618_v55 = vpop.f32.mrf.mxu3 }
 0x1c4   : > { %v619_v56 = vadd.f32 %v618_v55, %v594_v54 }
 0x1c6   : > { %v648_v57 = vmax.f32 %v619_v56, 0.0 }
 0x1c8   : > { %651 = vst [vmem:[%s354_s8] sm:$0xff] %v648_v57 }
 0x1cb   : > { %v620_v58 = vpop.f32.mrf.mxu3 }
 0x1eb   : > { %v631_v59 = vpop.f32.mrf.mxu3  ;;  %v644_v60 = vpop.f32.mrf.mxu0 }
 0x1ec   : > { %v632_v61 = vadd.f32 %v631_v59, %v594_v54  ;;  %v645_v62 = vadd.f32 %v644_v60, %v594_v54 }
 0x1ee   : > { %v649_v63 = vmax.f32 %v632_v61, 0.0  ;;  %v650_v0 = vmax.f32 %v645_v62, 0.0 }
 0x1f0   : > { %652 = vst [vmem:[%s354_s8 + $0x8] sm:$0xff] %v649_v63 }
 0x1f1   : > { %653 = vst [vmem:[%s354_s8 + $0x10] sm:$0xff] %v650_v0 }
 0x1f3   : > { %v633_v1 = vpop.f32.mrf.mxu3  ;;  %v646_v2 = vpop.f32.mrf.mxu0 }
 0x1f4 PF: > { %s16_s23 = sadd.s32 1, %s839_s23   ;;  %s1054_s21 = smov %s835_s22 }
 0x1f5   : > { %p13_p5 = scmp.ge.s32.totalorder %s16_s23, 4   ;;  %s1055_s22 = smov %s1057_s24 }
 0x1f7   :  { %15 = sbr.rel (!%p13_p5) target bundleno = 2 (0x2), region = 77 }

</bundles_post_ra>
